<compile_context>
chip_gen: v7x
topology: tpu7x:2x2x1
jax: 0.10.0
libtpu: 0.0.40
codegen_flags: <defaults>
</compile_context>

<pallas_src>
import functools

import jax
import jax.numpy as jnp
from jax import lax
from jax.experimental import pallas as pl
from jax.experimental.pallas import tpu as pltpu

EPS = 1e-5
LANE = 128


# ------------------------------ small helpers ------------------------------ #

def _rup(x, m):
    return (x + m - 1) // m * m


def _pick_tm(M, want):
    """Largest multiple of 8 dividing M that is <= want (fallback: single block).
    TODO(synk): replace the single-block fallback with a pl.cdiv grid + masked tail."""
    t = max(8, min(want, M) // 8 * 8)
    while t > 8 and M % t:
        t -= 8
    return t if M % t == 0 else M


def _pick_div(n, cap):
    """Largest divisor of n that is <= cap."""
    cap = max(1, min(n, cap))
    for d in range(cap, 0, -1):
        if n % d == 0:
            return d
    return 1


def _pad_mat(m2d, rows, cols):
    out = jnp.zeros((rows, cols), jnp.bfloat16)
    return out.at[: m2d.shape[0], : m2d.shape[1]].set(m2d.astype(jnp.bfloat16))


def _pad_vec(v, cols):
    out = jnp.zeros((1, cols), jnp.float32)
    return out.at[0, : v.shape[0]].set(v.astype(jnp.float32))


_VMEM_LIMIT = None


def _vmem_limit_bytes():
    """Generation-aware scoped-VMEM limit (v5e/v6e: 128 MiB physical, v7x: 64 MiB)."""
    global _VMEM_LIMIT
    if _VMEM_LIMIT is None:
        try:
            cap = int(pltpu.get_tpu_info().vmem_capacity_bytes)
        except Exception:  # conservative fallback (safe on every generation)
            cap = 64 * 1024 * 1024
        _VMEM_LIMIT = max(32 * 1024 * 1024, min(cap * 3 // 4, 100 * 1024 * 1024))
    return _VMEM_LIMIT


def _cparams(sem):
    return pltpu.CompilerParams(dimension_semantics=sem,
                                vmem_limit_bytes=_vmem_limit_bytes())


# --------------------------- kernel-side helpers --------------------------- #

def _bn_scale_shift(stats, g, b, m):
    """Per-channel scale/shift from running sum / sum-of-squares (training-mode BN)."""
    inv_m = 1.0 / m
    mean = stats[0:1, :] * inv_m
    var = jnp.maximum(stats[1:2, :] * inv_m - mean * mean, 0.0)
    scale = lax.rsqrt(var + EPS) * g
    return scale, b - mean * scale


def _bn_apply(x, stats, g, b, m):
    scale, shift = _bn_scale_shift(stats, g, b, m)
    return x.astype(jnp.float32) * scale + shift


def _partial_stats(y):
    """Per-tile sum / sum-of-squares stacked into one lane-dense (2, C) store."""
    axes = tuple(range(y.ndim - 1))
    c = y.shape[-1]
    s1 = jnp.sum(y, axis=axes, keepdims=True).reshape(1, c)
    s2 = jnp.sum(y * y, axis=axes, keepdims=True).reshape(1, c)
    return jnp.concatenate([s1, s2], axis=0)


# ------------------------------ kernel bodies ------------------------------ #

def _mm_stats_kernel(x_ref, w_ref, y_ref, st_ref):
    # 1x1 conv as an M-tiled matmul (bf16 in, f32 MXU accumulation) + per-tile stats.
    y = jnp.dot(x_ref[...], w_ref[...], preferred_element_type=jnp.float32)
    y_ref[...] = y.astype(y_ref.dtype)
    st_ref[...] = _partial_stats(y)


def _conv3x3_kernel(slab_ref, s1_ref, g1_ref, b1_ref, w_ref, y_ref, st_ref,
                    act_ref, acc_ref, *, stride, th, H, W, Wo, m0):
    """3x3 conv (padding=1, stride in {1,2}) for one (image, output-row-block) tile.

    slab_ref : (SR, s, Wq_pad, C) raw conv1 output rows [r*th*s, r*th*s+SR) of the
               zero-padded, W-phase-split canvas (2-row halo included).
    act_ref  : (SR//s, s, s, Wq_pad, C) bf16 scratch -- bn1+relu1 activated slab.
    acc_ref  : (th, Wq_pad, Cout) f32 scratch -- 9-tap accumulator stays in VMEM.
    """
    s = stride
    SR = slab_ref.shape[0]
    Wq_pad = slab_ref.shape[2]
    cout = w_ref.shape[-1]
    r = pl.program_id(1)
    g0 = r * (th * s)                            # canvas row offset of this slab

    # bn1 + relu1 fused prologue; re-zero conv-padding / alignment positions.
    scale, shift = _bn_scale_shift(s1_ref[...], g1_ref[...], b1_ref[...], m0)
    px_i = lax.broadcasted_iota(jnp.int32, (s, Wq_pad, 1), 0)
    wq_i = lax.broadcasted_iota(jnp.int32, (s, Wq_pad, 1), 1)
    wi = wq_i * s + px_i                         # canvas column index of each element
    col_ok = (wi >= 1) & (wi <= W)
    for ri in range(SR):
        gi = g0 + ri                             # canvas row index
        ok = col_ok & (gi >= 1) & (gi <= H)
        a = jnp.maximum(slab_ref[ri].astype(jnp.float32) * scale + shift, 0.0)
        act_ref[ri // s, ri % s] = jnp.where(ok, a, 0.0).astype(jnp.bfloat16)

    # 9 taps: leading-axis slice -> MXU matmul -> XLU roll -> accumulate in VMEM scratch.
    acc_ref[...] = jnp.zeros_like(acc_ref)
    for dy in range(3):
        qy, py = dy // s, dy % s
        for dx in range(3):
            qx, px = dx // s, dx % s
            a = act_ref[qy:qy + th, py, px]                       # (th, Wq_pad, C)
            mm = jnp.dot(a.reshape(th * Wq_pad, a.shape[-1]), w_ref[dy, dx],
                         preferred_element_type=jnp.float32)
            mm = mm.reshape(th, Wq_pad, cout)
            if qx:
                mm = pltpu.roll(mm, shift=Wq_pad - qx, axis=1)    # shift left by qx
            acc_ref[...] += mm

    out = acc_ref[:, :Wo, :]
    y_ref[...] = out.astype(y_ref.dtype)
    st_ref[...] = _partial_stats(out)


def _stage3_proj_kernel(y2_ref, s2_ref, g2_ref, b2_ref, w3_ref, xr_ref, wr_ref,
                        y3_ref, st3_ref, r_ref, str_ref, *, m2):
    # bn2+relu2 fused prologue -> conv3 (1x1); residual projection shares the row tile.
    th, wo, c2 = y2_ref.shape
    x = jnp.maximum(_bn_apply(y2_ref[...], s2_ref[...], g2_ref[...], b2_ref[...], m2), 0.0)
    x = x.astype(jnp.bfloat16).reshape(th * wo, c2)
    y3 = jnp.dot(x, w3_ref[...], preferred_element_type=jnp.float32)
    y3_ref[...] = y3.reshape(y3_ref.shape).astype(y3_ref.dtype)
    st3_ref[...] = _partial_stats(y3)
    xr = xr_ref[...].reshape(th * wo, xr_ref.shape[-1])
    rr = jnp.dot(xr, wr_ref[...], preferred_element_type=jnp.float32)
    r_ref[...] = rr.reshape(r_ref.shape).astype(r_ref.dtype)
    str_ref[...] = _partial_stats(rr)


def _stage3_id_kernel(y2_ref, s2_ref, g2_ref, b2_ref, w3_ref, y3_ref, st3_ref, *, m2):
    th, wo, c2 = y2_ref.shape
    x = jnp.maximum(_bn_apply(y2_ref[...], s2_ref[...], g2_ref[...], b2_ref[...], m2), 0.0)
    x = x.astype(jnp.bfloat16).reshape(th * wo, c2)
    y3 = jnp.dot(x, w3_ref[...], preferred_element_type=jnp.float32)
    y3_ref[...] = y3.reshape(y3_ref.shape).astype(y3_ref.dtype)
    st3_ref[...] = _partial_stats(y3)


def _final_proj_kernel(y3_ref, s3_ref, g3_ref, b3_ref, r_ref, sr_ref, gr_ref, br_ref,
                       o_ref, *, m2):
    # bn3(conv3) + bn_r(residual projection) + add + relu3, fused.
    out = _bn_apply(y3_ref[...], s3_ref[...], g3_ref[...], b3_ref[...], m2)
    out = out + _bn_apply(r_ref[...], sr_ref[...], gr_ref[...], br_ref[...], m2)
    o_ref[...] = jnp.maximum(out, 0.0).astype(o_ref.dtype)


def _final_id_kernel(y3_ref, s3_ref, g3_ref, b3_ref, r_ref, o_ref, *, m2):
    # bn3(conv3) + identity residual + relu3 (module uses identity iff Cin == Cout).
    out = _bn_apply(y3_ref[...], s3_ref[...], g3_ref[...], b3_ref[...], m2)
    out = out + r_ref[...].astype(jnp.float32)
    o_ref[...] = jnp.maximum(out, 0.0).astype(o_ref.dtype)


# ----------------------------- pallas_call wrappers ------------------------- #

def mm_stats(x, w, *, block_m):
    M, K = x.shape
    C = w.shape[1]
    tm = _pick_tm(M, block_m)
    nt = M // tm
    return pl.pallas_call(
        _mm_stats_kernel,
        grid=(nt,),
        in_specs=[pl.BlockSpec((tm, K), lambda i: (i, 0)),
                  pl.BlockSpec((K, C), lambda i: (0, 0))],
        out_specs=(pl.BlockSpec((tm, C), lambda i: (i, 0)),
                   pl.BlockSpec((None, 2, C), lambda i: (i, 0, 0))),
        out_shape=(jax.ShapeDtypeStruct((M, C), jnp.bfloat16),
                   jax.ShapeDtypeStruct((nt, 2, C), jnp.float32)),
        compiler_params=_cparams(("parallel",)),
    )(x, w)


def conv3x3_fused(slabs, s1, g1, b1, w2, *, stride, th, Ho, Wo, H, W, m0):
    N, n_rb, SR, s, Wq_pad, C = slabs.shape
    cout = w2.shape[-1]
    assert s == stride and n_rb * th == Ho and SR == th * stride + 2
    kern = functools.partial(_conv3x3_kernel, stride=stride, th=th, H=H, W=W, Wo=Wo,
                             m0=float(m0))
    return pl.pallas_call(
        kern,
        grid=(N, n_rb),
        in_specs=[
            pl.BlockSpec((None, None, SR, s, Wq_pad, C),
                         lambda n, r: (n, r, 0, 0, 0, 0)),
            pl.BlockSpec((2, C), lambda n, r: (0, 0)),
            pl.BlockSpec((1, C), lambda n, r: (0, 0)),
            pl.BlockSpec((1, C), lambda n, r: (0, 0)),
            pl.BlockSpec((3, 3, C, cout), lambda n, r: (0, 0, 0, 0)),
        ],
        out_specs=(
            pl.BlockSpec((None, th, Wo, cout), lambda n, r: (n, r, 0, 0)),
            pl.BlockSpec((None, 2, cout), lambda n, r: (n * n_rb + r, 0, 0)),
        ),
        out_shape=(
            jax.ShapeDtypeStruct((N, Ho, Wo, cout), jnp.bfloat16),
            jax.ShapeDtypeStruct((N * n_rb, 2, cout), jnp.float32),
        ),
        scratch_shapes=[
            pltpu.VMEM((SR // s, s, s, Wq_pad, C), jnp.bfloat16),   # activated slab
            pltpu.VMEM((th, Wq_pad, cout), jnp.float32),            # 9-tap accumulator
        ],
        compiler_params=_cparams(("parallel", "parallel")),
    )(slabs, s1, g1, b1, w2)


def stage3_proj(y2, s2, g2, b2, w3, xs, wr, *, th, m2):
    N, Ho, Wo, c2 = y2.shape
    cr = xs.shape[-1]
    c3 = w3.shape[-1]
    n_rb = Ho // th
    big2 = pl.BlockSpec((None, th, Wo, c2), lambda n, r: (n, r, 0, 0))
    bigr = pl.BlockSpec((None, th, Wo, cr), lambda n, r: (n, r, 0, 0))
    big3 = pl.BlockSpec((None, th, Wo, c3), lambda n, r: (n, r, 0, 0))
    stat = pl.BlockSpec((None, 2, c3), lambda n, r: (n * n_rb + r, 0, 0))
    small2 = pl.BlockSpec((2, c2), lambda n, r: (0, 0))
    vec2 = pl.BlockSpec((1, c2), lambda n, r: (0, 0))
    return pl.pallas_call(
        functools.partial(_stage3_proj_kernel, m2=float(m2)),
        grid=(N, n_rb),
        in_specs=[big2, small2, vec2, vec2,
                  pl.BlockSpec((c2, c3), lambda n, r: (0, 0)),
                  bigr,
                  pl.BlockSpec((cr, c3), lambda n, r: (0, 0))],
        out_specs=(big3, stat, big3, stat),
        out_shape=(jax.ShapeDtypeStruct((N, Ho, Wo, c3), jnp.bfloat16),
                   jax.ShapeDtypeStruct((N * n_rb, 2, c3), jnp.float32),
                   jax.ShapeDtypeStruct((N, Ho, Wo, c3), jnp.bfloat16),
                   jax.ShapeDtypeStruct((N * n_rb, 2, c3), jnp.float32)),
        compiler_params=_cparams(("parallel", "parallel")),
    )(y2, s2, g2, b2, w3, xs, wr)


def stage3_id(y2, s2, g2, b2, w3, *, th, m2):
    N, Ho, Wo, c2 = y2.shape
    c3 = w3.shape[-1]
    n_rb = Ho // th
    return pl.pallas_call(
        functools.partial(_stage3_id_kernel, m2=float(m2)),
        grid=(N, n_rb),
        in_specs=[pl.BlockSpec((None, th, Wo, c2), lambda n, r: (n, r, 0, 0)),
                  pl.BlockSpec((2, c2), lambda n, r: (0, 0)),
                  pl.BlockSpec((1, c2), lambda n, r: (0, 0)),
                  pl.BlockSpec((1, c2), lambda n, r: (0, 0)),
                  pl.BlockSpec((c2, c3), lambda n, r: (0, 0))],
        out_specs=(pl.BlockSpec((None, th, Wo, c3), lambda n, r: (n, r, 0, 0)),
                   pl.BlockSpec((None, 2, c3), lambda n, r: (n * n_rb + r, 0, 0))),
        out_shape=(jax.ShapeDtypeStruct((N, Ho, Wo, c3), jnp.bfloat16),
                   jax.ShapeDtypeStruct((N * n_rb, 2, c3), jnp.float32)),
        compiler_params=_cparams(("parallel", "parallel")),
    )(y2, s2, g2, b2, w3)


def final_proj(y3, s3, g3, b3, r, sr, gr, br, *, th, m2):
    N, Ho, Wo, C = y3.shape
    n_rb = Ho // th
    big = pl.BlockSpec((None, th, Wo, C), lambda n, rb: (n, rb, 0, 0))
    st = pl.BlockSpec((2, C), lambda n, rb: (0, 0))
    vec = pl.BlockSpec((1, C), lambda n, rb: (0, 0))
    return pl.pallas_call(
        functools.partial(_final_proj_kernel, m2=float(m2)),
        grid=(N, n_rb),
        in_specs=[big, st, vec, vec, big, st, vec, vec],
        out_specs=big,
        out_shape=jax.ShapeDtypeStruct((N, Ho, Wo, C), jnp.float32),
        compiler_params=_cparams(("parallel", "parallel")),
    )(y3, s3, g3, b3, r, sr, gr, br)


def final_id(y3, s3, g3, b3, xres, *, th, m2):
    N, Ho, Wo, C = y3.shape
    n_rb = Ho // th
    big = pl.BlockSpec((None, th, Wo, C), lambda n, rb: (n, rb, 0, 0))
    st = pl.BlockSpec((2, C), lambda n, rb: (0, 0))
    vec = pl.BlockSpec((1, C), lambda n, rb: (0, 0))
    return pl.pallas_call(
        functools.partial(_final_id_kernel, m2=float(m2)),
        grid=(N, n_rb),
        in_specs=[big, st, vec, vec, big],
        out_specs=big,
        out_shape=jax.ShapeDtypeStruct((N, Ho, Wo, C), jnp.float32),
        compiler_params=_cparams(("parallel", "parallel")),
    )(y3, s3, g3, b3, xres)


# -------------------------------- block forward ------------------------------ #

def bottleneck_forward(x_nchw, params, *, stride=1, block_m=512, block_rows=8):
    assert stride in (1, 2), "stride 1/2 supported (ResNet bottleneck)"
    N, Cin, H, W = x_nchw.shape
    w1, w2, w3 = params["w1"], params["w2"], params["w3"]
    Ci, Cout = w1.shape[0], w3.shape[0]
    has_proj = Cin != Cout                       # matches the nn.Module's rule

    Cin_p, Ci_p, Cout_p = _rup(Cin, LANE), _rup(Ci, LANE), _rup(Cout, LANE)
    Ho, Wo = (H - 1) // stride + 1, (W - 1) // stride + 1
    M0, M2 = N * H * W, N * Ho * Wo

    # NCHW -> NHWC, channel-pad to the 128-lane width, bf16 MXU inputs.
    # TODO(synk): fold this boundary transpose/pad into the first kernel's index_map.
    x = jnp.transpose(x_nchw, (0, 2, 3, 1))
    xp = jnp.pad(x, ((0, 0), (0, 0), (0, 0), (0, Cin_p - Cin))).astype(jnp.bfloat16)

    w1m = _pad_mat(w1[:, :, 0, 0].T, Cin_p, Ci_p)
    w3m = _pad_mat(w3[:, :, 0, 0].T, Ci_p, Cout_p)
    w2m = jnp.zeros((3, 3, Ci_p, Ci_p), jnp.bfloat16)
    w2m = w2m.at[:, :, :Ci, :Ci].set(jnp.transpose(w2, (2, 3, 1, 0)).astype(jnp.bfloat16))
    g1, b1 = _pad_vec(params["g1"], Ci_p), _pad_vec(params["b1"], Ci_p)
    g2, b2 = _pad_vec(params["g2"], Ci_p), _pad_vec(params["b2"], Ci_p)
    g3, b3 = _pad_vec(params["g3"], Cout_p), _pad_vec(params["b3"], Cout_p)

    # ---- stage 1: conv1 (1x1) matmul + per-tile batch stats ----
    y1_raw, st1 = mm_stats(xp.reshape(M0, Cin_p), w1m, block_m=block_m)
    s1 = jnp.sum(st1, axis=0)                    # (2, Ci_p) global sum / sum-of-squares

    # ---- stage 2: conv2 (3x3, stride, pad=1), bn1+relu1 fused as its prologue ----
    s = stride
    th = _pick_div(Ho, block_rows)               # output rows per grid step
    n_rb = Ho // th
    SR = th * s + 2                              # slab rows incl. 2-row halo
    Wq = Wo + 2 // s                             # per-W-phase columns incl. halo
    Wq_pad = _rup(Wq, 8)
    Hp = Ho * s + 2
    # Zero-padded canvas + W-phase split + halo-duplicated row slabs (one XLA relayout).
    # TODO(synk): fold this into conv1's out_spec / conv2's index_map to save one HBM trip.
    y1_img = y1_raw.reshape(N, H, W, Ci_p)
    canvas = jnp.zeros((N, Hp, s * Wq_pad, Ci_p), jnp.bfloat16)
    canvas = canvas.at[:, 1:1 + H, 1:1 + W, :].set(y1_img)
    ps = canvas.reshape(N, Hp, Wq_pad, s, Ci_p).transpose(0, 1, 3, 2, 4)
    rows = jnp.arange(n_rb)[:, None] * (th * s) + jnp.arange(SR)[None, :]
    slabs = ps[:, rows]                          # (N, n_rb, SR, s, Wq_pad, Ci_p)
    y2_raw, st2 = conv3x3_fused(slabs, s1, g1, b1, w2m, stride=s, th=th,
                                Ho=Ho, Wo=Wo, H=H, W=W, m0=M0)
    s2 = jnp.sum(st2, axis=0)

    # ---- residual input ----
    if stride == 1:
        xs_img = xp                              # free view, no extra HBM copy
    else:
        # TODO(synk): express this strided gather via the consuming kernel's index_map.
        xs_img = xp[:, ::stride, ::stride, :]

    # ---- stage 3: bn2+relu2 fused into conv3 (1x1); residual projection fused in ----
    th3 = _pick_div(Ho, max(1, block_m // max(Wo, 1)))
    if has_proj:
        wrm = _pad_mat(params["wr"][:, :, 0, 0].T, Cin_p, Cout_p)
        gr, br = _pad_vec(params["gr"], Cout_p), _pad_vec(params["br"], Cout_p)
        y3_raw, st3, r_raw, strs = stage3_proj(y2_raw, s2, g2, b2, w3m, xs_img, wrm,
                                               th=th3, m2=M2)
        s3, sr = jnp.sum(st3, axis=0), jnp.sum(strs, axis=0)
        out_nhwc = final_proj(y3_raw, s3, g3, b3, r_raw, sr, gr, br, th=th3, m2=M2)
    else:
        y3_raw, st3 = stage3_id(y2_raw, s2, g2, b2, w3m, th=th3, m2=M2)
        s3 = jnp.sum(st3, axis=0)
        out_nhwc = final_id(y3_raw, s3, g3, b3, xs_img, th=th3, m2=M2)

    # TODO(synk): fold the channel slice + NHWC->NCHW transpose into the final out_spec.
    return jnp.transpose(out_nhwc[..., :Cout], (0, 3, 1, 2))


# ---------------------------------- pure-JAX ref ------------------------------ #

def reference_forward(x, params, *, stride=1):
    def conv(a, w, s=1, p=0):
        return lax.conv_general_dilated(
            a, w, (s, s), [(p, p), (p, p)],
            dimension_numbers=("NCHW", "OIHW", "NCHW"),
            precision=lax.Precision.HIGHEST)

    def bn(a, g, b):
        m = jnp.mean(a, axis=(0, 2, 3), keepdims=True)
        v = jnp.mean(jnp.square(a - m), axis=(0, 2, 3), keepdims=True)
        return (a - m) * lax.rsqrt(v + EPS) * g.reshape(1, -1, 1, 1) + b.reshape(1, -1, 1, 1)

    out = jnp.maximum(bn(conv(x, params["w1"]), params["g1"], params["b1"]), 0.0)
    out = jnp.maximum(bn(conv(out, params["w2"], stride, 1), params["g2"], params["b2"]), 0.0)
    out = bn(conv(out, params["w3"]), params["g3"], params["b3"])
    if x.shape[1] != params["w3"].shape[0]:      # projection iff in_channels != out_channels
        res = bn(conv(x, params["wr"], stride), params["gr"], params["br"])
    else:
        res = x[:, :, ::stride, ::stride]
    return jnp.maximum(out + res, 0.0)


# ------------------------------------- main ----------------------------------- #

if __name__ == "__main__":
    def make_params(key, cin, ci, cout, with_proj):
        ks = jax.random.split(key, 12)
        p = {
            "w1": 0.1 * jax.random.normal(ks[0], (ci, cin, 1, 1), jnp.float32),
            "g1": 1.0 + 0.1 * jax.random.normal(ks[1], (ci,), jnp.float32),
            "b1": 0.1 * jax.random.normal(ks[2], (ci,), jnp.float32),
            "w2": 0.1 * jax.random.normal(ks[3], (ci, ci, 3, 3), jnp.float32),
            "g2": 1.0 + 0.1 * jax.random.normal(ks[4], (ci,), jnp.float32),
            "b2": 0.1 * jax.random.normal(ks[5], (ci,), jnp.float32),
            "w3": 0.1 * jax.random.normal(ks[6], (cout, ci, 1, 1), jnp.float32),
            "g3": 1.0 + 0.1 * jax.random.normal(ks[7], (cout,), jnp.float32),
            "b3": 0.1 * jax.random.normal(ks[8], (cout,), jnp.float32),
        }
        if with_proj:
            p["wr"] = 0.1 * jax.random.normal(ks[9], (cout, cin, 1, 1), jnp.float32)
            p["gr"] = 1.0 + 0.1 * jax.random.normal(ks[10], (cout,), jnp.float32)
            p["br"] = 0.1 * jax.random.normal(ks[11], (cout,), jnp.float32)
        return p

    key = jax.random.PRNGKey(0)
    k1, k2, k3, k4 = jax.random.split(key, 4)

    # block_m=256 here (production default 512-1024) so the toy shapes actually exercise
    # the multi-tile partial-stats reduction path.

    # Config 1: projection residual (Cin != Cout), stride 2.
    N, Cin, H, W, Ci, Cout, stride = 2, 4, 16, 16, 8, 16, 2
    params = make_params(k1, Cin, Ci, Cout, with_proj=True)
    x = jax.random.normal(k2, (N, Cin, H, W), jnp.float32)
    out = jax.block_until_ready(bottleneck_forward(x, params, stride=stride, block_m=256))
    ref = jax.block_until_ready(reference_forward(x, params, stride=stride))
    assert out.shape == ref.shape == (N, Cout, (H - 1) // stride + 1, (W - 1) // stride + 1)
    err1 = float(jnp.max(jnp.abs(out - ref)))
    # bf16 activations + three batch-norm rsqrt amplifications -> loose absolute tolerance
    assert err1 < 0.15, f"config1 max abs err {err1}"

    # Config 2: identity residual (Cin == Cout), stride 1 (matches the module's rule).
    N, Cin, H, W, Ci, Cout, stride = 2, 16, 16, 16, 8, 16, 1
    params = make_params(k3, Cin, Ci, Cout, with_proj=False)
    x = jax.random.normal(k4, (N, Cin, H, W), jnp.float32)
    out = jax.block_until_ready(bottleneck_forward(x, params, stride=stride, block_m=256))
    ref = jax.block_until_ready(reference_forward(x, params, stride=stride))
    assert out.shape == ref.shape == (N, Cout, H, W)
    err2 = float(jnp.max(jnp.abs(out - ref)))
    assert err2 < 0.15, f"config2 max abs err {err2}"

    print("KERNEL_OK")
</pallas_src>

<mosaic_0001>
module attributes {stable_mosaic.version = 11 : i64} {
  func.func @_mm_stats_kernel(%arg0: i32, %arg1: memref<256x128xbf16, #tpu.memory_space<vmem>>, %arg2: memref<128x128xbf16, #tpu.memory_space<vmem>>, %arg3: memref<256x128xbf16, #tpu.memory_space<vmem>>, %arg4: memref<1x2x128xf32, #tpu.memory_space<vmem>>) attributes {dimension_semantics = [#tpu.dimension_semantics<parallel>], iteration_bounds = array<i64: 2>, scalar_prefetch = 0 : i64, scratch_operands = 0 : i64, tpu.core_type = #tpu.core_type<tc>, window_params = [{transform_indices = @transform_0, window_bounds = array<i64: 256, 128>}, {pipeline_mode = #tpu.pipeline_mode<synchronous>, transform_indices = @transform_1, window_bounds = array<i64: 128, 128>}, {transform_indices = @transform_2, window_bounds = array<i64: 256, 128>}, {transform_indices = @transform_3, window_bounds = array<i64: 1, 2, 128>}]} {
    %c0 = arith.constant 0 : index
    %c0_0 = arith.constant 0 : index
    %0 = vector.load %arg1[%c0, %c0_0] : memref<256x128xbf16, #tpu.memory_space<vmem>>, vector<256x128xbf16>
    %c0_1 = arith.constant 0 : index
    %c0_2 = arith.constant 0 : index
    %1 = vector.load %arg2[%c0_1, %c0_2] : memref<128x128xbf16, #tpu.memory_space<vmem>>, vector<128x128xbf16>
    %cst = arith.constant dense<0.000000e+00> : vector<256x128xf32>
    %2 = tpu.matmul %0, %1, %cst {dimension_numbers = #tpu.dot_dimension_numbers<[1], [0], [0], [1], [0, 0, 1, 1], [], []>} : vector<256x128xbf16>, vector<128x128xbf16>, vector<256x128xf32> -> vector<256x128xf32>
    %3 = arith.truncf %2 : vector<256x128xf32> to vector<256x128xbf16>
    %c0_3 = arith.constant 0 : index
    %c0_4 = arith.constant 0 : index
    %4 = vector.load %arg3[%c0_3, %c0_4] : memref<256x128xbf16, #tpu.memory_space<vmem>>, vector<256x128xbf16>
    tpu.vector_store %arg3[%c0_3, %c0_4], %3 {strides = array<i32>} : memref<256x128xbf16, #tpu.memory_space<vmem>>, vector<256x128xbf16>,
    %cst_5 = arith.constant dense<0.000000e+00> : vector<128xf32>
    %5 = vector.multi_reduction <add>, %2, %cst_5 [0] : vector<256x128xf32> to vector<128xf32>
    %6 = vector.shape_cast %5 : vector<128xf32> to vector<1x128xf32>
    %7 = arith.mulf %2, %2 : vector<256x128xf32>
    %cst_6 = arith.constant dense<0.000000e+00> : vector<128xf32>
    %8 = vector.multi_reduction <add>, %7, %cst_6 [0] : vector<256x128xf32> to vector<128xf32>
    %9 = vector.shape_cast %8 : vector<128xf32> to vector<1x128xf32>
    %10 = tpu.concatenate %6, %9 in 0 : vector<1x128xf32>, vector<1x128xf32> -> vector<2x128xf32>
    %c0_7 = arith.constant 0 : index
    %c0_8 = arith.constant 0 : index
    %c0_9 = arith.constant 0 : index
    %11 = vector.load %arg4[%c0_7, %c0_8, %c0_9] : memref<1x2x128xf32, #tpu.memory_space<vmem>>, vector<1x2x128xf32>
    %12 = vector.shape_cast %11 : vector<1x2x128xf32> to vector<2x128xf32>
    %13 = vector.shape_cast %10 : vector<2x128xf32> to vector<1x2x128xf32>
    tpu.vector_store %arg4[%c0_7, %c0_8, %c0_9], %13 {strides = array<i32>} : memref<1x2x128xf32, #tpu.memory_space<vmem>>, vector<1x2x128xf32>,
    return
  }
  func.func @transform_0(%arg0: i32) -> (i32, i32) {
    %c0_i32 = arith.constant 0 : i32
    %c0_i32_0 = arith.constant 0 : i32
    return %arg0, %c0_i32 : i32, i32
  }
  func.func @transform_1(%arg0: i32) -> (i32, i32) {
    %c0_i32 = arith.constant 0 : i32
    %c0_i32_0 = arith.constant 0 : i32
    %c0_i32_1 = arith.constant 0 : i32
    return %c0_i32, %c0_i32_0 : i32, i32
  }
  func.func @transform_2(%arg0: i32) -> (i32, i32) {
    %c0_i32 = arith.constant 0 : i32
    %c0_i32_0 = arith.constant 0 : i32
    return %arg0, %c0_i32 : i32, i32
  }
  func.func @transform_3(%arg0: i32) -> (i32, i32, i32) {
    %c0_i32 = arith.constant 0 : i32
    %c0_i32_0 = arith.constant 0 : i32
    %c0_i32_1 = arith.constant 0 : i32
    return %arg0, %c0_i32, %c0_i32_0 : i32, i32, i32
  }
}

</mosaic_0001>

<bundles_post_ra>
// kernel: tpu_custom_call.1
= control target key start
LH: loop header
LB: loop body
LE: loop exit
PB: predicated region body
PF: predicated region fallthrough
CT: control target
= control target key end

     0   :  { %9 = vsyncpa [#allocation3], 0  ;;  %s1934_s0 = inlined_call_operand.hbm [shape: bf16[512,128], index: 0, kind: input, shape index: {}]   ;;  %s1935_s1 = inlined_call_operand.hbm [shape: bf16[128,128], index: 1, kind: input, shape index: {}]   ;;  %s1936_s2 = inlined_call_operand.hbm [shape: bf16[512,128], index: 2, kind: output, shape index: {0}]   ;;  %s1937_s3 = inlined_call_operand.hbm [shape: f32[2,2,128], index: 3, kind: output, shape index: {1}]  }
   0x1   :  { %11 = vsyncpa [#allocation3 + $0x1], 0 }
   0x2   :  { %12 = vsyncpa [#allocation6], 0 }
   0x3   :  { %13 = vsyncpa [#allocation4], 0 }
   0x4   :  { %15 = vsyncpa [#allocation4 + $0x1], 0 }
   0x5   :  { %16 = vsyncpa [#allocation9], 0 }
   0x6   :  { %18 = vsyncpa [#allocation9 + $0x1], 0  ;;  %s1559_s12 = smov 0   ;;  %s1561_s13 = smov 0  }
   0x7   :  { %s1563_s14 = smov 0   ;;  %s1565_s15 = smov 0  }
   0x8 LB: > { %s1580_s16 = sadd.s32 4294967295, %s1529_s15   ;;  %s987_s17 = sadd.s32 4294967294, %s1529_s15   ;;  %s1529_s15 = sphi %s1565_s15, %s1957_s15   ;;  %s1525_s14 = sphi %s1563_s14, %s1956_s14   ;;  %s1521_s13 = sphi %s1561_s13, %s1955_s13   ;;  %s1517_s12 = sphi %s1559_s12, %s1954_s12  }
   0x9   : > { %p44_p0 = scmp.ne.s32.totalorder %s1521_s13, %s1517_s12  ;;  %p1938_p1 = scmp.eq.s32.totalorder %s1580_s16, 0 }
   0xa   : > { %p95_p3 = scmp.eq.s32.totalorder %s987_s17, 1  ;;  %p988_p5 = scmp.ge.s32.totalorder %s1529_s15, 1 }
   0xb   : > { %p1589_p4 = por %p1938_p1, %p44_p0  ;;  %p128_p7 = scmp.lt.s32.totalorder %s1529_s15, 3 }
   0xc   : > { %p1594_p6 = por %p95_p3, %p44_p0  ;;  %s1531_s21 = smov [#allocation5]  }
   0xd   : > { %s1941_s18 = scalar_select %p1589_p4, 1, 0 }
   0xe   : > { %s1942_s19 = scalar_select %p1594_p6, 1, 0 }
   0xf   : > { %p1599_p8 = pnand %p988_p5, %p128_p7  ;;  %s140_s22 = sshll.u32 %s1531_s21, 4  ;;  %s1603_s22 = int_to_ptr.vmem [resolvable:$true] %s140_s22 }
  0x10   : > { %s1615_s24 = sadd.s32 1, %s1529_s15   ;;  %s31_s25 = sadd.s32 1, %s1525_s14 }
  0x11   : > { %s1943_s20 = scalar_select %p1599_p8, 1, 0 }
  0x12   : > { %p1289_p9 = pneg %p1599_p8  ;;  %s28_s26 = ssub.s32 %s1529_s15, %s1615_s24 }
  0x13   : > { %s1369_s29 = scalar_lea.hbm %s1935_s1, 1024 }
  0x14   : > { %p1610_p11 = pnand %p1289_p9, %p1938_p1  ;;  %p1370_p12 = scmp.ne.s32.totalorder %s1935_s1, %s1369_s29 }
  0x15   : > { %p1376_p5 = scmp.lt.u32.totalorder %s1369_s29, %s1935_s1 }
  0x16   : > { %p1371_p13 = pneg %p1610_p11 }
  0x18   : > { %p1372_p0 = pnand %p1371_p13, %p1370_p12 }
  0x1a   : > { %p1373_p3 = pneg %p1372_p0 }
  0x1c   : > { %p1378_p7 = pnand %p1376_p5, %p1373_p3 }
  0x1e   : > { %1381 = shalt.err (!%p1378_p7)
}
  0x1f   : > { %s1382_s7 = scalar_lea.vmem %s1603_s22, 1024  ;;  %p1390_p2 = scmp.lt.s32.totalorder %s1603_s22, %s1603_s22 }
  0x20   : > { %p1383_p9 = scmp.ne.s32.totalorder %s1603_s22, %s1382_s7  ;;  %p1391_p6 = scmp.lt.s32.totalorder %s1382_s7, %s1382_s7 }
  0x22   : > { %p1385_p10 = pnand %p1383_p9, %p1371_p13  ;;  %p1392_p4 = por %p1391_p6, %p1390_p2 }
  0x24   : > { %p1386_p1 = pneg %p1385_p10 }
  0x26   : > { %p1393_p8 = pnand %p1392_p4, %p1386_p1 }
  0x28   : > { %1396 = shalt.err (!%p1393_p8)
}
  0x29   : > { %s1532_s8 = smov 64   ;;  %s1533_s9 = smov 4  }
  0x2a   : > { %1292 = dma.hbm_to_vmem [thread:$0]  (!%p1610_p11), %s1935_s1, 1024, %s1603_s22, [#allocation6], %s1532_s8, %s1532_s8, %s1533_s9  }
  0x2b   : > { %p29_p1 = scmp.eq.s32.totalorder %s28_s26, 0  ;;  %p38_p2 = scmp.ne.s32.totalorder %s1525_s14, %s1521_s13 }
  0x2c   : > { %p39_p4 = scmp.eq.s32.totalorder %s1529_s15, 0  ;;  %p1305_p6 = scmp.lt.s32.totalorder %s1529_s15, 2 }
  0x2d   : > { %s1649_s17 = scalar_select %p29_p1, %s1525_s14, %s31_s25  }
  0x2e   : > { %p40_p8 = por %p39_p4, %p38_p2  ;;  %p1945_p10 = scmp.eq.s32.totalorder %s1580_s16, 1 }
  0x2f   : > { %s154_s23 = sand.u32 1, %s1525_s14   ;;  %s1062_s27 = sshll.u32 %s1529_s15, 11 }
  0x30   : > { %p1653_p12 = por %p1945_p10, %p38_p2  ;;  %s991_s28 = sshll.u32 %s154_s23, 7 }
  0x31   : > { %s1662_s4 = scalar_lea.hbm %s1934_s0, %s1062_s27  ;;  %s158_s22 = scalar_lea.vmem [#allocation2], %s991_s28 }
  0x32   : > { %s165_s25 = sshll.u32 %s158_s22, 4  ;;  %p1664_p11 = pnand %p1305_p6, %p40_p8  ;;  %s1668_s25 = int_to_ptr.vmem [resolvable:$true] %s165_s25 }
  0x33   : > { %s1670_s5 = scalar_lea.sflag [#allocation3], %s154_s23  ;;  %s1397_s6 = scalar_lea.hbm %s1662_s4, 2048 }
  0x34   : > { %p1398_p13 = scmp.ne.s32.totalorder %s1662_s4, %s1397_s6  ;;  %p1399_p0 = pneg %p1664_p11 }
  0x35   : > { %s1402_s11 = scalar_lea.hbm %s1934_s0, 4096  ;;  %p1403_p7 = scmp.lt.u32.totalorder %s1662_s4, %s1934_s0 }
  0x36   : > { %p1400_p3 = pnand %p1399_p0, %p1398_p13  ;;  %p1404_p9 = scmp.lt.u32.totalorder %s1402_s11, %s1397_s6 }
  0x37   : > { %p1406_p2 = scmp.lt.u32.totalorder %s1397_s6, %s1662_s4 }
  0x38   : > { %p1401_p5 = pneg %p1400_p3  ;;  %p1405_p1 = por %p1404_p9, %p1403_p7 }
  0x3a   : > { %p1407_p4 = por %p1406_p2, %p1405_p1 }
  0x3c   : > { %p1408_p6 = pnand %p1407_p4, %p1401_p5 }
  0x3e   : > { %1411 = shalt.err (!%p1408_p6)
}
  0x3f   : > { %s1412_s23 = scalar_lea.vmem %s1668_s25, 2048  ;;  %s1534_s29 = smov [#allocation2]  }
  0x40   : > { %p1413_p8 = scmp.ne.s32.totalorder %s1668_s25, %s1412_s23  ;;  %s1417_s30 = sshll.u32 %s1534_s29, 4  ;;  %s1418_s30 = int_to_ptr.vmem [resolvable:$false] %s1417_s30 }
  0x41   : > { %s1419_s22 = scalar_lea.vmem %s1418_s30, 4096  ;;  %p1420_p3 = scmp.lt.s32.totalorder %s1668_s25, %s1418_s30 }
  0x42   : > { %p1415_p10 = pnand %p1413_p8, %p1399_p0  ;;  %p1421_p7 = scmp.lt.s32.totalorder %s1419_s22, %s1412_s23 }
  0x44   : > { %p1416_p13 = pneg %p1415_p10  ;;  %p1422_p9 = por %p1421_p7, %p1420_p3 }
  0x46   : > { %p1423_p1 = pnand %p1422_p9, %p1416_p13 }
  0x48   : > { %1426 = shalt.err (!%p1423_p1)
}
  0x49   : > { %1296 = dma.hbm_to_vmem [thread:$0]  (!%p1664_p11), %s1662_s4, 2048, %s1668_s25, %s1670_s5, %s1532_s8, %s1532_s8, %s1533_s9  }
  0x4a   : > { %p1948_p0 = scmp.ne.s32.totalorder %s1943_s20, 0 }
  0x4b   : > { %s1704_s6 = sand.u32 (!%p1948_p0), 1, %s1521_s13   ;;  %p1949_p5 = scmp.ne.s32.totalorder (!%p1948_p0), %s1941_s18, 0 }
  0x4c   : > { %177 = sbr.rel (%p1948_p0) target bundleno = 437 (0x1b5), region = 28  ;;  %s995_s7 = sshll.u32 (!%p1948_p0), %s1704_s6, 7 }
  0x4d   : > { %s180_s10 = scalar_lea.sflag (!%p1948_p0), [#allocation3], %s1704_s6  ;;  %s1710_s26 = scalar_lea.vmem (!%p1948_p0), [#allocation2], %s995_s7 }
  0x53   : > { %1500 = dma.done.wait (%p1949_p5), %s180_s10, 2048  }
  0x54   : > { %1502 = vsyncadd (%p1949_p5), %s180_s10, 4294965248  ;;  %p1950_p11 = scmp.eq.s32.totalorder %s1580_s16, 0 }
  0x56   : > { %1504 = dma.done.wait (%p1950_p11), [#allocation6], 1024   ;;  %p1951_p2 = pmov %p1950_p11 }
  0x57   : > { %v1345_v0 = vld [vmem:[#allocation5] sm:$0xff]   ;;  %v1346_v1 = vld [vmem:[#allocation5 + $0x8] sm:$0xff]   ;;  %v1347_v2 = vld [vmem:[#allocation5 + $0x10] sm:$0xff]   ;;  %s1750_s18 = scalar_lea.vmem [#allocation7], %s995_s7  ;;  %s1095_s20 = sshll.u32 %s1580_s16, 11 }
  0x58   : > { %1506 = vsyncadd (%p1951_p2), [#allocation6], 4294966272  ;;  %1215 = vmatprep.subr.bf16.mxu0 %v1345_v0  ;;  %1263 = vmatprep.subr.bf16.mxu1 %v1345_v0  ;;  %v1348_v3 = vld [vmem:[#allocation5 + $0x18] sm:$0xff]   ;;  %v1353_v4 = vld [vmem:[%s1710_s26] sm:$0xff]   ;;  %s859_s8 = sshll.u32 %s1750_s18, 4  ;;  %s1803_s25 = scalar_lea.hbm %s1936_s2, %s1095_s20  ;;  %s1805_s8 = int_to_ptr.vmem [resolvable:$true] %s859_s8 }
  0x59   : > { %1216 = vmatpush3.bf16.msra.mxu0 %v1345_v0  ;;  %1271 = vmatpush3.bf16.msra.mxu1 %v1345_v0  ;;  %v1349_v5 = vld [vmem:[#allocation5 + $0x20] sm:$0xff]   ;;  %v1350_v6 = vld [vmem:[#allocation5 + $0x28] sm:$0xff]   ;;  %v1351_v8 = vld [vmem:[#allocation5 + $0x30] sm:$0xff]   ;;  %s841_s5 = scalar_lea.sflag [#allocation4], %s1704_s6  ;;  %s1427_s11 = scalar_lea.vmem %s1805_s8, 2048 }
  0x5a   : > { %1217 = vmatprep.subr.bf16.mxu0 %v1346_v1  ;;  %1264 = vmatprep.subr.bf16.mxu1 %v1346_v1  ;;  %v1361_v7 = vld [vmem:[%s1710_s26 + $0x40] sm:$0xff]   ;;  %v1352_v9 = vld [vmem:[#allocation5 + $0x38] sm:$0xff]   ;;  %v1354_v10 = vld [vmem:[%s1710_s26 + $0x8] sm:$0xff]   ;;  %p1428_p4 = scmp.ne.s32.totalorder %s1805_s8, %s1427_s11  ;;  %s1535_s27 = smov [#allocation7]  }
  0x5b   : > { %1231 = vmatprep.mubr.bf16.mxu0 %v1353_v4  ;;  %1247 = vmatprep.mubr.bf16.mxu1 %v1361_v7  ;;  %v1362_v11 = vld [vmem:[%s1710_s26 + $0x48] sm:$0xff]   ;;  %v1355_v12 = vld [vmem:[%s1710_s26 + $0x10] sm:$0xff]   ;;  %v1356_v14 = vld [vmem:[%s1710_s26 + $0x18] sm:$0xff]   ;;  %s1431_s28 = sshll.u32 %s1535_s27, 4  ;;  %s1432_s28 = int_to_ptr.vmem [resolvable:$false] %s1431_s28 }
  0x5c   : > { %v1363_v13 = vld [vmem:[%s1710_s26 + $0x50] sm:$0xff]   ;;  %v1364_v15 = vld [vmem:[%s1710_s26 + $0x58] sm:$0xff]   ;;  %v1357_v16 = vld [vmem:[%s1710_s26 + $0x20] sm:$0xff]   ;;  %p1429_p6 = pnand %p1428_p4, %p1653_p12  ;;  %s1433_s23 = scalar_lea.vmem %s1432_s28, 4096 }
  0x5d   : > { %1218 = vmatpush3.bf16.msra.mxu0 %v1346_v1  ;;  %1272 = vmatpush3.bf16.msra.mxu1 %v1346_v1  ;;  %v1365_v17 = vld [vmem:[%s1710_s26 + $0x60] sm:$0xff]   ;;  %v1358_v18 = vld [vmem:[%s1710_s26 + $0x28] sm:$0xff]   ;;  %v1359_v20 = vld [vmem:[%s1710_s26 + $0x30] sm:$0xff]   ;;  %p1434_p10 = scmp.lt.s32.totalorder %s1805_s8, %s1432_s28  ;;  %p1435_p13 = scmp.lt.s32.totalorder %s1433_s23, %s1427_s11 }
  0x5e   : > { %1219 = vmatprep.subr.bf16.mxu0 %v1347_v2  ;;  %1265 = vmatprep.subr.bf16.mxu1 %v1347_v2  ;;  %v1366_v19 = vld [vmem:[%s1710_s26 + $0x68] sm:$0xff]   ;;  %v1367_v21 = vld [vmem:[%s1710_s26 + $0x70] sm:$0xff]   ;;  %v1360_v22 = vld [vmem:[%s1710_s26 + $0x38] sm:$0xff]   ;;  %p1430_p8 = pneg %p1429_p6 }
  0x5f   : > { %v1368_v23 = vld [vmem:[%s1710_s26 + $0x78] sm:$0xff]   ;;  %p1436_p3 = por %p1435_p13, %p1434_p10 }
  0x61   : > { %1220 = vmatpush3.bf16.msra.mxu0 %v1347_v2  ;;  %1273 = vmatpush3.bf16.msra.mxu1 %v1347_v2  ;;  %p1437_p7 = pnand %p1436_p3, %p1430_p8 }
  0x62   : > { %1221 = vmatprep.subr.bf16.mxu0 %v1348_v3  ;;  %1266 = vmatprep.subr.bf16.mxu1 %v1348_v3 }
  0x65   : > { %1222 = vmatpush3.bf16.msra.mxu0 %v1348_v3  ;;  %1274 = vmatpush3.bf16.msra.mxu1 %v1348_v3 }
  0x66   : > { %1223 = vmatprep.subr.bf16.mxu0 %v1349_v5  ;;  %1267 = vmatprep.subr.bf16.mxu1 %v1349_v5 }
  0x69   : > { %1224 = vmatpush3.bf16.msra.mxu0 %v1349_v5  ;;  %1275 = vmatpush3.bf16.msra.mxu1 %v1349_v5 }
  0x6a   : > { %1225 = vmatprep.subr.bf16.mxu0 %v1350_v6  ;;  %1268 = vmatprep.subr.bf16.mxu1 %v1350_v6 }
  0x6d   : > { %1226 = vmatpush3.bf16.msra.mxu0 %v1350_v6  ;;  %1276 = vmatpush3.bf16.msra.mxu1 %v1350_v6 }
  0x6e   : > { %1227 = vmatprep.subr.bf16.mxu0 %v1351_v8  ;;  %1269 = vmatprep.subr.bf16.mxu1 %v1351_v8 }
  0x71   : > { %1228 = vmatpush3.bf16.msra.mxu0 %v1351_v8  ;;  %1277 = vmatpush3.bf16.msra.mxu1 %v1351_v8 }
  0x72   : > { %1229 = vmatprep.subr.bf16.mxu0 %v1352_v9  ;;  %1270 = vmatprep.subr.bf16.mxu1 %v1352_v9 }
  0x75   : > { %1230 = vmatpush3.bf16.msra.mxu0 %v1352_v9  ;;  %1278 = vmatpush3.bf16.msra.mxu1 %v1352_v9 }
  0x78   : > { %1232 = vmatmul.mubr.bf16.vlgmr.msra.gmra.mrb[0].mxu0 %v1354_v10  ;;  %1248 = vmatmul.mubr.bf16.vlgmr.msra.gmra.mrb[0].mxu1 %v1362_v11 }
  0x79   : > { %1235 = vmatprep.mubr.bf16.mxu0 %v1355_v12  ;;  %1251 = vmatprep.mubr.bf16.mxu1 %v1363_v13 }
  0x80   : > { %1236 = vmatmul.mubr.bf16.gmra.mrb[4].mxu0 %v1356_v14  ;;  %1252 = vmatmul.mubr.bf16.gmra.mrb[4].mxu1 %v1364_v15 }
  0x81   : > { %1239 = vmatprep.mubr.bf16.mxu0 %v1357_v16  ;;  %1255 = vmatprep.mubr.bf16.mxu1 %v1365_v17 }
  0x88   : > { %1240 = vmatmul.mubr.bf16.gmra.mrb[8].mxu0 %v1358_v18  ;;  %1256 = vmatmul.mubr.bf16.gmra.mrb[8].mxu1 %v1366_v19 }
  0x89   : > { %1243 = vmatprep.mubr.bf16.mxu0 %v1359_v20  ;;  %1259 = vmatprep.mubr.bf16.mxu1 %v1367_v21 }
  0x90   : > { %1244 = vmatmul.mubr.bf16.gmra.mrb[12].mxu0 %v1360_v22  ;;  %1260 = vmatmul.mubr.bf16.gmra.mrb[12].mxu1 %v1368_v23 }
 0x14b   : > { %v1233_v24 = vpop.f32.mrb[0].mxu0  ;;  %v1736_v25 = vpop.f32.mrb[0].mxu1 }
 0x14c   : > { %v444_v26 = vpop.f32.mrb[1].mxu0  ;;  %v1738_v27 = vpop.f32.mrb[1].mxu1  ;;  %v770_v39 = vmul.f32 %v1233_v24, %v1233_v24 }
 0x14d   : > { %v1234_v28 = vpop.f32.mrb[2].mxu0  ;;  %v1740_v29 = vpop.f32.mrb[2].mxu1  ;;  %v768_v30 = vmul.f32 %v444_v26, %v444_v26 }
 0x14e   : > { %v1104_v31 = vpack.c.bf16 %v1234_v28, %v1233_v24  ;;  %v447_v32 = vpop.f32.mrb[3].mxu0  ;;  %v1144_v33 = vpack.c.bf16 %v1740_v29, %v1736_v25  ;;  %v1744_v34 = vpop.f32.mrb[3].mxu1  ;;  %v771_v42 = vmul.f32 %v1234_v28, %v1234_v28 }
 0x14f   : > { %v1099_v35 = vpack.c.bf16 %v447_v32, %v444_v26  ;;  %v731_v36 = vadd.f32 %v447_v32, %v444_v26  ;;  %v769_v37 = vmul.f32 %v447_v32, %v447_v32  ;;  %v1139_v38 = vpack.c.bf16 %v1744_v34, %v1738_v27 }
 0x150   : > { %1176 = vst [vmem:[%s1750_s18 + $0x8] sm:$0xff] %v1104_v31   ;;  %1184 = vst [vmem:[%s1750_s18 + $0x48] sm:$0xff] %v1144_v33  }
 0x151   : > { %1100 = vst [vmem:[%s1750_s18] sm:$0xff] %v1099_v35   ;;  %v732_v40 = vadd.f32 %v1233_v24, %v731_v36  ;;  %v800_v41 = vadd.f32 %v769_v37, %v768_v30  ;;  %1183 = vst [vmem:[%s1750_s18 + $0x40] sm:$0xff] %v1139_v38  }
 0x153   : > { %v801_v43 = vadd.f32 %v800_v41, %v770_v39  ;;  %v1237_v44 = vpop.f32.mrb[4].mxu0  ;;  %v733_v45 = vadd.f32 %v1234_v28, %v732_v40  ;;  %v1756_v46 = vpop.f32.mrb[4].mxu1 }
 0x154   : > { %v460_v47 = vpop.f32.mrb[5].mxu0  ;;  %v1758_v48 = vpop.f32.mrb[5].mxu1  ;;  %v774_v63 = vmul.f32 %v1237_v44, %v1237_v44 }
 0x155   : > { %v734_v49 = vadd.f32 %v733_v45, %v460_v47  ;;  %v772_v50 = vmul.f32 %v460_v47, %v460_v47  ;;  %v802_v51 = vadd.f32 %v801_v43, %v771_v42  ;;  %v1238_v52 = vpop.f32.mrb[6].mxu0  ;;  %v1760_v53 = vpop.f32.mrb[6].mxu1 }
 0x156   : > { %v1114_v54 = vpack.c.bf16 %v1238_v52, %v1237_v44  ;;  %v463_v55 = vpop.f32.mrb[7].mxu0  ;;  %v1154_v56 = vpack.c.bf16 %v1760_v53, %v1756_v46  ;;  %v1764_v57 = vpop.f32.mrb[7].mxu1  ;;  %v775_v2 = vmul.f32 %v1238_v52, %v1238_v52 }
 0x157   : > { %v803_v58 = vadd.f32 %v802_v51, %v772_v50  ;;  %v1109_v59 = vpack.c.bf16 %v463_v55, %v460_v47  ;;  %v735_v60 = vadd.f32 %v734_v49, %v463_v55  ;;  %v773_v61 = vmul.f32 %v463_v55, %v463_v55 }
 0x158   : > { %1178 = vst [vmem:[%s1750_s18 + $0x18] sm:$0xff] %v1114_v54   ;;  %1186 = vst [vmem:[%s1750_s18 + $0x58] sm:$0xff] %v1154_v56   ;;  %v1149_v62 = vpack.c.bf16 %v1764_v57, %v1758_v48 }
 0x159   : > { %1177 = vst [vmem:[%s1750_s18 + $0x10] sm:$0xff] %v1109_v59   ;;  %v736_v0 = vadd.f32 %v1237_v44, %v735_v60  ;;  %v804_v1 = vadd.f32 %v803_v58, %v773_v61  ;;  %v784_v61 = vmul.f32 %v1738_v27, %v1738_v27 }
 0x15a   : > { %1185 = vst [vmem:[%s1750_s18 + $0x50] sm:$0xff] %v1149_v62  }
 0x15b   : > { %v805_v3 = vadd.f32 %v804_v1, %v774_v63  ;;  %v1241_v4 = vpop.f32.mrb[8].mxu0  ;;  %v737_v5 = vadd.f32 %v1238_v52, %v736_v0  ;;  %v1772_v6 = vpop.f32.mrb[8].mxu1 }
 0x15c   : > { %v476_v7 = vpop.f32.mrb[9].mxu0  ;;  %v1774_v8 = vpop.f32.mrb[9].mxu1  ;;  %v778_v23 = vmul.f32 %v1241_v4, %v1241_v4 }
 0x15d   : > { %v738_v9 = vadd.f32 %v737_v5, %v476_v7  ;;  %v776_v10 = vmul.f32 %v476_v7, %v476_v7  ;;  %v806_v11 = vadd.f32 %v805_v3, %v775_v2  ;;  %v1242_v12 = vpop.f32.mrb[10].mxu0  ;;  %v1776_v13 = vpop.f32.mrb[10].mxu1 }
 0x15e   : > { %v1124_v14 = vpack.c.bf16 %v1242_v12, %v1241_v4  ;;  %v479_v15 = vpop.f32.mrb[11].mxu0  ;;  %v1164_v16 = vpack.c.bf16 %v1776_v13, %v1772_v6  ;;  %v1780_v17 = vpop.f32.mrb[11].mxu1  ;;  %v779_v28 = vmul.f32 %v1242_v12, %v1242_v12 }
 0x15f   : > { %v807_v18 = vadd.f32 %v806_v11, %v776_v10  ;;  %v1119_v19 = vpack.c.bf16 %v479_v15, %v476_v7  ;;  %v739_v20 = vadd.f32 %v738_v9, %v479_v15  ;;  %v777_v21 = vmul.f32 %v479_v15, %v479_v15 }
 0x160   : > { %1180 = vst [vmem:[%s1750_s18 + $0x28] sm:$0xff] %v1124_v14   ;;  %1188 = vst [vmem:[%s1750_s18 + $0x68] sm:$0xff] %v1164_v16   ;;  %v1159_v22 = vpack.c.bf16 %v1780_v17, %v1774_v8 }
 0x161   : > { %1179 = vst [vmem:[%s1750_s18 + $0x20] sm:$0xff] %v1119_v19   ;;  %v740_v24 = vadd.f32 %v1241_v4, %v739_v20  ;;  %v808_v26 = vadd.f32 %v807_v18, %v777_v21 }
 0x162   : > { %1187 = vst [vmem:[%s1750_s18 + $0x60] sm:$0xff] %v1159_v22  }
 0x163   : > { %v809_v30 = vadd.f32 %v808_v26, %v778_v23  ;;  %v1245_v31 = vpop.f32.mrb[12].mxu0  ;;  %v741_v32 = vadd.f32 %v1242_v12, %v740_v24  ;;  %v1788_v33 = vpop.f32.mrb[12].mxu1 }
 0x164   : > { %v492_v35 = vpop.f32.mrb[13].mxu0  ;;  %v1790_v36 = vpop.f32.mrb[13].mxu1  ;;  %v782_v54 = vmul.f32 %v1245_v31, %v1245_v31 }
 0x165   : > { %v742_v37 = vadd.f32 %v741_v32, %v492_v35  ;;  %v780_v38 = vmul.f32 %v492_v35, %v492_v35  ;;  %v810_v39 = vadd.f32 %v809_v30, %v779_v28  ;;  %v1246_v40 = vpop.f32.mrb[14].mxu0  ;;  %v1794_v41 = vpop.f32.mrb[14].mxu1 }
 0x166   : > { %v1134_v42 = vpack.c.bf16 %v1246_v40, %v1245_v31  ;;  %v495_v43 = vpop.f32.mrb[15].mxu0  ;;  %v1174_v44 = vpack.c.bf16 %v1794_v41, %v1788_v33  ;;  %v1798_v45 = vpop.f32.mrb[15].mxu1  ;;  %v783_v58 = vmul.f32 %v1246_v40, %v1246_v40 }
 0x167   : > { %v811_v47 = vadd.f32 %v810_v39, %v780_v38  ;;  %v1129_v49 = vpack.c.bf16 %v495_v43, %v492_v35  ;;  %v743_v50 = vadd.f32 %v742_v37, %v495_v43  ;;  %v781_v51 = vmul.f32 %v495_v43, %v495_v43 }
 0x168   : > { %1182 = vst [vmem:[%s1750_s18 + $0x38] sm:$0xff] %v1134_v42   ;;  %1190 = vst [vmem:[%s1750_s18 + $0x78] sm:$0xff] %v1174_v44   ;;  %v1169_v52 = vpack.c.bf16 %v1798_v45, %v1790_v36 }
 0x169   : > { %1181 = vst [vmem:[%s1750_s18 + $0x30] sm:$0xff] %v1129_v49   ;;  %v744_v55 = vadd.f32 %v1245_v31, %v743_v50  ;;  %v812_v56 = vadd.f32 %v811_v47, %v781_v51 }
 0x16a   : > { %1189 = vst [vmem:[%s1750_s18 + $0x70] sm:$0xff] %v1169_v52  }
 0x16b   : > { %v813_v59 = vadd.f32 %v812_v56, %v782_v54  ;;  %v745_v60 = vadd.f32 %v1246_v40, %v744_v55 }
 0x16c   : > { %1440 = shalt.err (!%p1437_p7)
}
 0x16d   : > { %s1441_s29 = scalar_lea.hbm %s1803_s25, 2048  ;;  %s1445_s7 = scalar_lea.hbm %s1936_s2, 4096 }
 0x16e   : > { %p1442_p9 = scmp.ne.s32.totalorder %s1803_s25, %s1441_s29  ;;  %p1446_p5 = scmp.lt.u32.totalorder %s1803_s25, %s1936_s2 }
 0x16f   : > { %p1447_p11 = scmp.lt.u32.totalorder %s1445_s7, %s1441_s29  ;;  %p1449_p4 = scmp.lt.u32.totalorder %s1441_s29, %s1803_s25 }
 0x170   : > { %p1443_p1 = pnand %p1442_p9, %p1653_p12 }
 0x171   : > { %p1448_p2 = por %p1447_p11, %p1446_p5 }
 0x172   : > { %p1444_p0 = pneg %p1443_p1 }
 0x173   : > { %p1450_p6 = por %p1449_p4, %p1448_p2 }
 0x175   : > { %p1451_p8 = pnand %p1450_p6, %p1444_p0 }
 0x177   : > { %1454 = shalt.err (!%p1451_p8)
}
 0x178   : > { %s1536_s18 = smov 64   ;;  %s1537_s20 = smov 4   ;;  %v746_v62 = vadd.f32 %v745_v60, %v1738_v27  ;;  %v814_v63 = vadd.f32 %v813_v59, %v783_v58  ;;  %v785_v2 = vmul.f32 %v1744_v34, %v1744_v34  ;;  %v786_v3 = vmul.f32 %v1736_v25, %v1736_v25 }
 0x179   : > { %1285 = dma.vmem_to_hbm [thread:$0]  (%p1653_p12), %s1805_s8, 2048, %s1803_s25, %s841_s5, %s1536_s18, %s1536_s18, %s1537_s20   ;;  %v787_v7 = vmul.f32 %v1740_v29, %v1740_v29  ;;  %v788_v27 = vmul.f32 %v1758_v48, %v1758_v48  ;;  %v789_v15 = vmul.f32 %v1764_v57, %v1764_v57  ;;  %v793_v24 = vmul.f32 %v1780_v17, %v1780_v17 }
 0x17a   : > { %v815_v0 = vadd.f32 %v814_v63, %v784_v61  ;;  %v747_v1 = vadd.f32 %v746_v62, %v1744_v34  ;;  %v798_v38 = vmul.f32 %v1788_v33, %v1788_v33  ;;  %s998_s8 = sshll.u32 %s1704_s6, 1  ;;  %s1059_s9 = sshll.u32 %s1580_s16, 5  ;;  %vm837_vm0 = vcmask 1040384  }
 0x17b   : > { %s214_s4 = scalar_lea.vmem [#allocation8], %s998_s8  ;;  %s1890_s27 = scalar_lea.hbm %s1937_s3, %s1059_s9 }
 0x17c   : > { %v748_v4 = vadd.f32 %v1736_v25, %v747_v1  ;;  %v816_v5 = vadd.f32 %v815_v0, %v785_v2  ;;  %v790_v25 = vmul.f32 %v1756_v46, %v1756_v46  ;;  %s875_s25 = sshll.u32 %s214_s4, 4  ;;  %s846_s28 = scalar_lea.sflag [#allocation9], %s1704_s6  ;;  %s1892_s25 = int_to_ptr.vmem [resolvable:$true] %s875_s25 }
 0x17d   : > { %s1455_s23 = scalar_lea.vmem %s1892_s25, 32  ;;  %s1538_s16 = smov [#allocation8]  }
 0x17e   : > { %v817_v9 = vadd.f32 %v816_v5, %v786_v3  ;;  %v749_v10 = vadd.f32 %v1740_v29, %v748_v4  ;;  %v791_v29 = vmul.f32 %v1760_v53, %v1760_v53  ;;  %p1456_p10 = scmp.ne.s32.totalorder %s1892_s25, %s1455_s23  ;;  %s1459_s29 = sshll.u32 %s1538_s16, 4  ;;  %s1460_s29 = int_to_ptr.vmem [resolvable:$false] %s1459_s29 }
 0x17f   : > { %s1461_s30 = scalar_lea.vmem %s1460_s29, 64  ;;  %p1462_p7 = scmp.lt.s32.totalorder %s1892_s25, %s1460_s29 }
 0x180   : > { %v750_v11 = vadd.f32 %v749_v10, %v1758_v48  ;;  %v818_v12 = vadd.f32 %v817_v9, %v787_v7  ;;  %v792_v48 = vmul.f32 %v1774_v8, %v1774_v8  ;;  %p1457_p13 = pnand %p1456_p10, %p1653_p12  ;;  %p1463_p9 = scmp.lt.s32.totalorder %s1461_s30, %s1455_s23 }
 0x182   : > { %v819_v14 = vadd.f32 %v818_v12, %v788_v27  ;;  %v751_v34 = vadd.f32 %v750_v11, %v1764_v57  ;;  %p1458_p3 = pneg %p1457_p13  ;;  %p1464_p1 = por %p1463_p9, %p1462_p7 }
 0x184   : > { %v752_v16 = vadd.f32 %v1756_v46, %v751_v34  ;;  %v820_v18 = vadd.f32 %v819_v14, %v789_v15  ;;  %v794_v46 = vmul.f32 %v1772_v6, %v1772_v6  ;;  %p1465_p0 = pnand %p1464_p1, %p1458_p3 }
 0x186   : > { %v821_v19 = vadd.f32 %v820_v18, %v790_v25  ;;  %v753_v20 = vadd.f32 %v1760_v53, %v752_v16  ;;  %v795_v53 = vmul.f32 %v1776_v13, %v1776_v13 }
 0x188   : > { %v754_v21 = vadd.f32 %v753_v20, %v1774_v8  ;;  %v822_v22 = vadd.f32 %v821_v19, %v791_v29  ;;  %v796_v8 = vmul.f32 %v1790_v36, %v1790_v36 }
 0x18a   : > { %v823_v23 = vadd.f32 %v822_v22, %v792_v48  ;;  %v755_v57 = vadd.f32 %v754_v21, %v1780_v17 }
 0x18c   : > { %v756_v26 = vadd.f32 %v1772_v6, %v755_v57  ;;  %v824_v28 = vadd.f32 %v823_v23, %v793_v24  ;;  %v797_v6 = vmul.f32 %v1798_v45, %v1798_v45 }
 0x18e   : > { %v825_v30 = vadd.f32 %v824_v28, %v794_v46  ;;  %v757_v31 = vadd.f32 %v1776_v13, %v756_v26  ;;  %v799_v13 = vmul.f32 %v1794_v41, %v1794_v41 }
 0x190   : > { %v758_v32 = vadd.f32 %v757_v31, %v1790_v36  ;;  %v826_v35 = vadd.f32 %v825_v30, %v795_v53 }
 0x192   : > { %v827_v17 = vadd.f32 %v826_v35, %v796_v8  ;;  %v759_v37 = vadd.f32 %v758_v32, %v1798_v45 }
 0x194   : > { %v760_v39 = vadd.f32 %v1788_v33, %v759_v37  ;;  %v828_v40 = vadd.f32 %v827_v17, %v797_v6 }
 0x196   : > { %v761_v36 = vadd.f32 %v1794_v41, %v760_v39  ;;  %v829_v42 = vadd.f32 %v828_v40, %v798_v38 }
 0x198   : > { %v762_v43 = vrot.slane %v761_v36, 4  ;;  %v830_v44 = vadd.f32 %v829_v42, %v799_v13 }
 0x19a   : > { %v763_v47 = vadd.f32 %v762_v43, %v761_v36  ;;  %v831_v49 = vrot.slane %v830_v44, 4 }
 0x19c   : > { %v764_v50 = vrot.slane %v763_v47, 2  ;;  %v832_v51 = vadd.f32 %v831_v49, %v830_v44 }
 0x19e   : > { %v765_v45 = vadd.f32 %v764_v50, %v763_v47  ;;  %v833_v52 = vrot.slane %v832_v51, 2 }
 0x1a0   : > { %v766_v54 = vrot.slane %v765_v45, 1  ;;  %v834_v33 = vadd.f32 %v833_v52, %v832_v51 }
 0x1a2   : > { %v835_v55 = vrot.slane %v834_v33, 1  ;;  %v767_v41 = vadd.f32 %v766_v54, %v765_v45 }
 0x1a4   : > { %v836_v56 = vadd.f32 %v835_v55, %v834_v33 }
 0x1a6   : > { %v838_v58 = vsel %vm837_vm0, %v767_v41, %v836_v56 }
 0x1a7   : > { %839 = vst [vmem:[%s214_s4] sm:$0x3] %v838_v58 }
 0x1a8   : > { %1468 = shalt.err (!%p1465_p0)
}
 0x1a9   : > { %s1469_s6 = scalar_lea.hbm %s1890_s27, 32  ;;  %s1473_s10 = scalar_lea.hbm %s1937_s3, 64 }
 0x1aa   : > { %p1470_p5 = scmp.ne.s32.totalorder %s1890_s27, %s1469_s6  ;;  %p1474_p4 = scmp.lt.u32.totalorder %s1890_s27, %s1937_s3 }
 0x1ab   : > { %p1475_p6 = scmp.lt.u32.totalorder %s1473_s10, %s1469_s6  ;;  %p1477_p10 = scmp.lt.u32.totalorder %s1469_s6, %s1890_s27 }
 0x1ac   : > { %p1471_p11 = pnand %p1470_p5, %p1653_p12 }
 0x1ad   : > { %p1476_p8 = por %p1475_p6, %p1474_p4 }
 0x1ae   : > { %p1472_p2 = pneg %p1471_p11 }
 0x1af   : > { %p1478_p13 = por %p1477_p10, %p1476_p8 }
 0x1b1   : > { %p1479_p3 = pnand %p1478_p13, %p1472_p2 }
 0x1b3   : > { %1482 = shalt.err (!%p1479_p3)
}
 0x1b4   : > { %1286 = dma.vmem_to_hbm [thread:$0]  (%p1653_p12), %s1892_s25, 32, %s1890_s27, %s846_s28  }
 0x1b5 PF: > { %s887_s20 = sand.u32 1, %s1517_s12   ;;  %p1952_p7 = scmp.ne.s32.totalorder %s1942_s19, 0 }
 0x1b6   : > { %p1953_p9 = scmp.ge.s32.totalorder %s1529_s15, 2  ;;  %s888_s8 = scalar_lea.sflag [#allocation4], %s887_s20 }
 0x1b8   : > { %p1298_p1 = pnand %p1953_p9, %p1952_p7 }
 0x1ba   : > { %1508 = dma.done.wait (!%p1298_p1), %s888_s8, 2048  }
 0x1bb   : > { %1510 = vsyncadd (!%p1298_p1), %s888_s8, 4294965248  ;;  %s897_s9 = scalar_lea.sflag [#allocation9], %s887_s20 }
 0x1bc   : > { %1512 = dma.done.wait (!%p1298_p1), %s897_s9, 32  }
 0x1bd   : > { %1514 = vsyncadd (!%p1298_p1), %s897_s9, 4294967264  ;;  %p21_p12 = scmp.ge.s32.totalorder %s1615_s24, 4   ;;  %s1954_s12 = smov %s1521_s13 }
 0x1be   : > { %s1955_s13 = smov %s1525_s14  ;;  %s1956_s14 = smov %s1649_s17 }
 0x1bf   : > { %s1957_s15 = smov %s1615_s24  ;;  %23 = sbr.rel (!%p21_p12) target bundleno = 8 (0x8), region = 94 }
 0x1c6   :  { %902 = vsyncpa [#allocation3], 1 }
 0x1c7   :  { %904 = vsyncpa [#allocation3 + $0x1], 1 }
 0x1c8   :  { %905 = vsyncpa [#allocation6], 1 }
 0x1c9   :  { %906 = vsyncpa [#allocation4], 1 }
 0x1ca   :  { %908 = vsyncpa [#allocation4 + $0x1], 1 }
 0x1cb   :  { %909 = vsyncpa [#allocation9], 1 }
 0x1cc   :  { %911 = vsyncpa [#allocation9 + $0x1], 1 }

</bundles_post_ra>
